<compile_context>
chip_gen: v6e
topology: v6e:2x2x1
jax: 0.10.0
libtpu: 0.0.40
codegen_flags: <defaults>
</compile_context>

<pallas_src>
import jax
import jax.numpy as jnp
from jax.experimental import pallas as pl
from jax.experimental.pallas import tpu as pltpu

EPS = 1e-5


def _choose_c_tile(C, cap=512):
    """Largest multiple-of-8 divisor of C that is <= cap; else full C."""
    if C <= cap:
        return C
    best = 0
    t = 8
    while t <= cap:
        if C % t == 0:
            best = t
        t += 8
    return best if best else C


def _choose_lane_width(step):
    """Width of the lane-wide partial-sum accumulators."""
    if step > 128 and step % 128 == 0:
        return 128          # fold step into 128-lane partials with VPU adds
    return step             # no fold (avoids unaligned lane shifts)


def _make_stats_kernel(nk, lw):
    def kernel(x_ref, sum_ref, sq_ref):
        # x_ref: (TC, step) slab; sum_ref/sq_ref: (TC, LW) resident partials.
        @pl.when(pl.program_id(1) == 0)   # first batch step for this C-tile
        def _init():
            sum_ref[...] = jnp.zeros_like(sum_ref)
            sq_ref[...] = jnp.zeros_like(sq_ref)

        x = x_ref[...].astype(jnp.float32)
        if nk == 1:
            # Pure VPU accumulate, lane-dense stores to the VMEM accumulator.
            sum_ref[...] += x
            sq_ref[...] += x * x
        else:
            # step = nk * 128: fold the nk lane-aligned chunks with VPU adds.
            s = x[:, 0:lw]
            q = s * s
            for k in range(1, nk):
                c = x[:, k * lw:(k + 1) * lw]
                s = s + c
                q = q + c * c
            sum_ref[...] += s
            sq_ref[...] += q
    return kernel


def _make_apply_kernel(inv_n):
    def kernel(x_ref, sum_ref, sq_ref, gamma_ref, beta_ref, o_ref):
        # x_ref/o_ref: (TC, step); sum/sq: (TC, LW); gamma/beta: (TC, 1).
        # Tiny per-tile scale/shift recompute (one lane reduce + EUP rsqrt);
        # negligible next to the (TC, step) streaming work.
        ssum = jnp.sum(sum_ref[...], axis=1, keepdims=True)
        ssq = jnp.sum(sq_ref[...], axis=1, keepdims=True)
        mean = ssum * inv_n
        var = jnp.maximum(ssq * inv_n - mean * mean, 0.0)   # clamp: no NaN
        inv = jax.lax.rsqrt(var + EPS)
        scale = gamma_ref[...] * inv
        shift = beta_ref[...] - mean * scale
        x = x_ref[...].astype(jnp.float32)
        o_ref[...] = (x * scale + shift).astype(o_ref.dtype)
    return kernel


@jax.jit
def norm_data_forward(x, gamma, beta):
    """x: (bs, c, num_joints, step); gamma, beta: (c*num_joints,)"""
    bs, c, num_joints, step = x.shape
    C = c * num_joints

    # Free, contiguous view — no HBM data movement.
    x3 = x.reshape(bs, C, step)

    TC = _choose_c_tile(C)
    LW = _choose_lane_width(step)
    NK = step // LW
    n_ctiles = pl.cdiv(C, TC)

    # Pass 1: per-channel lane-wide partial sums / sums-of-squares,
    # accumulated over the batch (reduction axis last in the grid).
    ssum, ssq = pl.pallas_call(
        _make_stats_kernel(NK, LW),
        out_shape=(
            jax.ShapeDtypeStruct((C, LW), jnp.float32),
            jax.ShapeDtypeStruct((C, LW), jnp.float32),
        ),
        grid=(n_ctiles, bs),
        in_specs=[pl.BlockSpec((None, TC, step), lambda j, b: (b, j, 0))],
        out_specs=(
            pl.BlockSpec((TC, LW), lambda j, b: (j, 0)),
            pl.BlockSpec((TC, LW), lambda j, b: (j, 0)),
        ),
        compiler_params=pltpu.CompilerParams(
            dimension_semantics=("parallel", "arbitrary")),
    )(x3)

    gamma2 = gamma.reshape(C, 1).astype(jnp.float32)
    beta2 = beta.reshape(C, 1).astype(jnp.float32)
    inv_n = 1.0 / float(bs * step)

    # Pass 2: y = x * scale + shift, scale/shift derived in-kernel from the
    # partials (no between-call XLA launch). Both grid axes independent.
    y3 = pl.pallas_call(
        _make_apply_kernel(inv_n),
        out_shape=jax.ShapeDtypeStruct((bs, C, step), x.dtype),
        grid=(n_ctiles, bs),
        in_specs=[
            pl.BlockSpec((None, TC, step), lambda j, b: (b, j, 0)),
            pl.BlockSpec((TC, LW), lambda j, b: (j, 0)),
            pl.BlockSpec((TC, LW), lambda j, b: (j, 0)),
            pl.BlockSpec((TC, 1), lambda j, b: (j, 0)),
            pl.BlockSpec((TC, 1), lambda j, b: (j, 0)),
        ],
        out_specs=pl.BlockSpec((None, TC, step), lambda j, b: (b, j, 0)),
        compiler_params=pltpu.CompilerParams(
            dimension_semantics=("parallel", "parallel")),
    )(x3, ssum, ssq, gamma2, beta2)

    return y3.reshape(bs, c, num_joints, step)


def _reference(x, gamma, beta):
    bs, c, J, step = x.shape
    C = c * J
    xr = x.reshape(bs, C, step).astype(jnp.float32)
    mean = jnp.mean(xr, axis=(0, 2), keepdims=True)
    var = jnp.mean((xr - mean) ** 2, axis=(0, 2), keepdims=True)
    y = (xr - mean) / jnp.sqrt(var + EPS)
    y = y * gamma.reshape(1, C, 1) + beta.reshape(1, C, 1)
    return y.reshape(bs, c, J, step).astype(x.dtype)


if __name__ == "__main__":
    # Small shapes consistent with the module: num_joints must be 25
    # (BatchNorm1d(dim*25)); pick dim=4, batch=2, step=8.
    bs, dim, num_joints, step = 2, 4, 25, 8
    C = dim * num_joints

    key = jax.random.PRNGKey(0)
    kx, kg, kb = jax.random.split(key, 3)
    x = jax.random.normal(kx, (bs, dim, num_joints, step), dtype=jnp.float32)
    # PyTorch default affine is gamma=1, beta=0; use random values so the
    # affine path is actually exercised.
    gamma = 1.0 + 0.1 * jax.random.normal(kg, (C,), dtype=jnp.float32)
    beta = 0.1 * jax.random.normal(kb, (C,), dtype=jnp.float32)

    y = jax.block_until_ready(norm_data_forward(x, gamma, beta))

    y_ref = _reference(x, gamma, beta)
    assert y.shape == (bs, dim, num_joints, step)
    assert jnp.allclose(y, y_ref, atol=1e-4, rtol=1e-4), "mismatch vs reference"

    print("KERNEL_OK")
</pallas_src>

<mosaic_0001>
module attributes {stable_mosaic.version = 11 : i64} {
  func.func @kernel(%arg0: i32, %arg1: i32, %arg2: memref<1x100x8xf32, #tpu.memory_space<vmem>>, %arg3: memref<100x8xf32, #tpu.memory_space<vmem>>, %arg4: memref<100x8xf32, #tpu.memory_space<vmem>>) attributes {dimension_semantics = [#tpu.dimension_semantics<parallel>, #tpu.dimension_semantics<arbitrary>], iteration_bounds = array<i64: 1, 2>, scalar_prefetch = 0 : i64, scratch_operands = 0 : i64, tpu.core_type = #tpu.core_type<tc>, window_params = [{transform_indices = @transform_0, window_bounds = array<i64: 1, 100, 8>}, {transform_indices = @transform_1, window_bounds = array<i64: 100, 8>}, {transform_indices = @transform_2, window_bounds = array<i64: 100, 8>}]} {
    %c0_i32 = arith.constant 0 : i32
    %0 = arith.cmpi eq, %arg1, %c0_i32 : i32
    %1 = arith.extui %0 : i1 to i32
    %c0_i32_0 = arith.constant 0 : i32
    %2 = arith.cmpi ne, %1, %c0_i32_0 : i32
    scf.if %2 {
      %cst = arith.constant 0.000000e+00 : f32
      %12 = vector.broadcast %cst : f32 to vector<100x8xf32>
      %c0_11 = arith.constant 0 : index
      %c0_12 = arith.constant 0 : index
      %13 = vector.load %arg3[%c0_11, %c0_12] : memref<100x8xf32, #tpu.memory_space<vmem>>, vector<100x8xf32>
      tpu.vector_store %arg3[%c0_11, %c0_12], %12 {strides = array<i32>} : memref<100x8xf32, #tpu.memory_space<vmem>>, vector<100x8xf32>,
      %cst_13 = arith.constant 0.000000e+00 : f32
      %14 = vector.broadcast %cst_13 : f32 to vector<100x8xf32>
      %c0_14 = arith.constant 0 : index
      %c0_15 = arith.constant 0 : index
      %15 = vector.load %arg4[%c0_14, %c0_15] : memref<100x8xf32, #tpu.memory_space<vmem>>, vector<100x8xf32>
      tpu.vector_store %arg4[%c0_14, %c0_15], %14 {strides = array<i32>} : memref<100x8xf32, #tpu.memory_space<vmem>>, vector<100x8xf32>,
    } else {
    }
    %c0 = arith.constant 0 : index
    %c0_1 = arith.constant 0 : index
    %c0_2 = arith.constant 0 : index
    %3 = vector.load %arg2[%c0, %c0_1, %c0_2] : memref<1x100x8xf32, #tpu.memory_space<vmem>>, vector<1x100x8xf32>
    %4 = vector.shape_cast %3 : vector<1x100x8xf32> to vector<100x8xf32>
    %c0_3 = arith.constant 0 : index
    %c0_4 = arith.constant 0 : index
    %5 = vector.load %arg3[%c0_3, %c0_4] : memref<100x8xf32, #tpu.memory_space<vmem>>, vector<100x8xf32>
    %6 = arith.addf %5, %4 : vector<100x8xf32>
    %c0_5 = arith.constant 0 : index
    %c0_6 = arith.constant 0 : index
    %7 = vector.load %arg3[%c0_5, %c0_6] : memref<100x8xf32, #tpu.memory_space<vmem>>, vector<100x8xf32>
    tpu.vector_store %arg3[%c0_5, %c0_6], %6 {strides = array<i32>} : memref<100x8xf32, #tpu.memory_space<vmem>>, vector<100x8xf32>,
    %c0_7 = arith.constant 0 : index
    %c0_8 = arith.constant 0 : index
    %8 = vector.load %arg4[%c0_7, %c0_8] : memref<100x8xf32, #tpu.memory_space<vmem>>, vector<100x8xf32>
    %9 = arith.mulf %4, %4 : vector<100x8xf32>
    %10 = arith.addf %8, %9 : vector<100x8xf32>
    %c0_9 = arith.constant 0 : index
    %c0_10 = arith.constant 0 : index
    %11 = vector.load %arg4[%c0_9, %c0_10] : memref<100x8xf32, #tpu.memory_space<vmem>>, vector<100x8xf32>
    tpu.vector_store %arg4[%c0_9, %c0_10], %10 {strides = array<i32>} : memref<100x8xf32, #tpu.memory_space<vmem>>, vector<100x8xf32>,
    return
  }
  func.func @transform_0(%arg0: i32, %arg1: i32) -> (i32, i32, i32) {
    %c0_i32 = arith.constant 0 : i32
    %c0_i32_0 = arith.constant 0 : i32
    return %arg1, %arg0, %c0_i32 : i32, i32, i32
  }
  func.func @transform_1(%arg0: i32, %arg1: i32) -> (i32, i32) {
    %c0_i32 = arith.constant 0 : i32
    %c0_i32_0 = arith.constant 0 : i32
    return %arg0, %c0_i32 : i32, i32
  }
  func.func @transform_2(%arg0: i32, %arg1: i32) -> (i32, i32) {
    %c0_i32 = arith.constant 0 : i32
    %c0_i32_0 = arith.constant 0 : i32
    return %arg0, %c0_i32 : i32, i32
  }
}

module attributes {stable_mosaic.version = 11 : i64} {
  func.func @kernel(%arg0: i32, %arg1: i32, %arg2: memref<1x100x8xf32, #tpu.memory_space<vmem>>, %arg3: memref<100x8xf32, #tpu.memory_space<vmem>>, %arg4: memref<100x8xf32, #tpu.memory_space<vmem>>, %arg5: memref<100x1xf32, #tpu.memory_space<vmem>>, %arg6: memref<100x1xf32, #tpu.memory_space<vmem>>, %arg7: memref<1x100x8xf32, #tpu.memory_space<vmem>>) attributes {dimension_semantics = [#tpu.dimension_semantics<parallel>, #tpu.dimension_semantics<parallel>], iteration_bounds = array<i64: 1, 2>, scalar_prefetch = 0 : i64, scratch_operands = 0 : i64, tpu.core_type = #tpu.core_type<tc>, window_params = [{transform_indices = @transform_0, window_bounds = array<i64: 1, 100, 8>}, {transform_indices = @transform_1, window_bounds = array<i64: 100, 8>}, {transform_indices = @transform_2, window_bounds = array<i64: 100, 8>}, {transform_indices = @transform_3, window_bounds = array<i64: 100, 1>}, {transform_indices = @transform_4, window_bounds = array<i64: 100, 1>}, {transform_indices = @transform_5, window_bounds = array<i64: 1, 100, 8>}]} {
    %c0 = arith.constant 0 : index
    %c0_0 = arith.constant 0 : index
    %0 = vector.load %arg3[%c0, %c0_0] : memref<100x8xf32, #tpu.memory_space<vmem>>, vector<100x8xf32>
    %cst = arith.constant dense<0.000000e+00> : vector<100xf32>
    %1 = vector.multi_reduction <add>, %0, %cst [1] : vector<100x8xf32> to vector<100xf32>
    %2 = vector.shape_cast %1 : vector<100xf32> to vector<100x1xf32>
    %c0_1 = arith.constant 0 : index
    %c0_2 = arith.constant 0 : index
    %3 = vector.load %arg4[%c0_1, %c0_2] : memref<100x8xf32, #tpu.memory_space<vmem>>, vector<100x8xf32>
    %cst_3 = arith.constant dense<0.000000e+00> : vector<100xf32>
    %4 = vector.multi_reduction <add>, %3, %cst_3 [1] : vector<100x8xf32> to vector<100xf32>
    %5 = vector.shape_cast %4 : vector<100xf32> to vector<100x1xf32>
    %cst_4 = arith.constant 6.250000e-02 : f32
    %6 = vector.broadcast %cst_4 : f32 to vector<100x1xf32>
    %7 = arith.mulf %2, %6 : vector<100x1xf32>
    %cst_5 = arith.constant 6.250000e-02 : f32
    %8 = vector.broadcast %cst_5 : f32 to vector<100x1xf32>
    %9 = arith.mulf %5, %8 : vector<100x1xf32>
    %10 = arith.mulf %7, %7 : vector<100x1xf32>
    %11 = arith.subf %9, %10 : vector<100x1xf32>
    %cst_6 = arith.constant 0.000000e+00 : f32
    %12 = vector.broadcast %cst_6 : f32 to vector<100x1xf32>
    %13 = arith.maximumf %11, %12 : vector<100x1xf32>
    %cst_7 = arith.constant 9.99999974E-6 : f32
    %14 = vector.broadcast %cst_7 : f32 to vector<100x1xf32>
    %15 = arith.addf %13, %14 : vector<100x1xf32>
    %16 = math.rsqrt %15 : vector<100x1xf32>
    %c0_8 = arith.constant 0 : index
    %c0_9 = arith.constant 0 : index
    %17 = vector.load %arg5[%c0_8, %c0_9] : memref<100x1xf32, #tpu.memory_space<vmem>>, vector<100x1xf32>
    %18 = arith.mulf %17, %16 : vector<100x1xf32>
    %c0_10 = arith.constant 0 : index
    %c0_11 = arith.constant 0 : index
    %19 = vector.load %arg6[%c0_10, %c0_11] : memref<100x1xf32, #tpu.memory_space<vmem>>, vector<100x1xf32>
    %20 = arith.mulf %7, %18 : vector<100x1xf32>
    %21 = arith.subf %19, %20 : vector<100x1xf32>
    %c0_12 = arith.constant 0 : index
    %c0_13 = arith.constant 0 : index
    %c0_14 = arith.constant 0 : index
    %22 = vector.load %arg2[%c0_12, %c0_13, %c0_14] : memref<1x100x8xf32, #tpu.memory_space<vmem>>, vector<1x100x8xf32>
    %23 = vector.shape_cast %22 : vector<1x100x8xf32> to vector<100x8xf32>
    %24 = vector.broadcast %18 : vector<100x1xf32> to vector<100x8xf32>
    %25 = arith.mulf %23, %24 : vector<100x8xf32>
    %26 = vector.broadcast %21 : vector<100x1xf32> to vector<100x8xf32>
    %27 = arith.addf %25, %26 : vector<100x8xf32>
    %c0_15 = arith.constant 0 : index
    %c0_16 = arith.constant 0 : index
    %c0_17 = arith.constant 0 : index
    %28 = vector.load %arg7[%c0_15, %c0_16, %c0_17] : memref<1x100x8xf32, #tpu.memory_space<vmem>>, vector<1x100x8xf32>
    %29 = vector.shape_cast %28 : vector<1x100x8xf32> to vector<100x8xf32>
    %30 = vector.shape_cast %27 : vector<100x8xf32> to vector<1x100x8xf32>
    tpu.vector_store %arg7[%c0_15, %c0_16, %c0_17], %30 {strides = array<i32>} : memref<1x100x8xf32, #tpu.memory_space<vmem>>, vector<1x100x8xf32>,
    return
  }
  func.func @transform_0(%arg0: i32, %arg1: i32) -> (i32, i32, i32) {
    %c0_i32 = arith.constant 0 : i32
    %c0_i32_0 = arith.constant 0 : i32
    return %arg1, %arg0, %c0_i32 : i32, i32, i32
  }
  func.func @transform_1(%arg0: i32, %arg1: i32) -> (i32, i32) {
    %c0_i32 = arith.constant 0 : i32
    %c0_i32_0 = arith.constant 0 : i32
    return %arg0, %c0_i32 : i32, i32
  }
  func.func @transform_2(%arg0: i32, %arg1: i32) -> (i32, i32) {
    %c0_i32 = arith.constant 0 : i32
    %c0_i32_0 = arith.constant 0 : i32
    return %arg0, %c0_i32 : i32, i32
  }
  func.func @transform_3(%arg0: i32, %arg1: i32) -> (i32, i32) {
    %c0_i32 = arith.constant 0 : i32
    %c0_i32_0 = arith.constant 0 : i32
    return %arg0, %c0_i32 : i32, i32
  }
  func.func @transform_4(%arg0: i32, %arg1: i32) -> (i32, i32) {
    %c0_i32 = arith.constant 0 : i32
    %c0_i32_0 = arith.constant 0 : i32
    return %arg0, %c0_i32 : i32, i32
  }
  func.func @transform_5(%arg0: i32, %arg1: i32) -> (i32, i32, i32) {
    %c0_i32 = arith.constant 0 : i32
    %c0_i32_0 = arith.constant 0 : i32
    return %arg1, %arg0, %c0_i32 : i32, i32, i32
  }
}

</mosaic_0001>

<bundles_post_ra>
// kernel: norm_data_forward.2
= control target key start
LH: loop header
LB: loop body
LE: loop exit
PB: predicated region body
PF: predicated region fallthrough
CT: control target
= control target key end

     0   :  { %s502_s9 = smov 0   ;;  %s504_s10 = smov 0   ;;  %s833_s0 = inlined_call_operand.vmem [shape: f32[2,100,8], index: 0, kind: input, shape index: {}]   ;;  %s834_s1 = inlined_call_operand.vmem [shape: f32[100,8], index: 1, kind: output, shape index: {0}]   ;;  %s835_s2 = inlined_call_operand.vmem [shape: f32[100,8], index: 2, kind: output, shape index: {1}]  }
   0x1   :  { %s506_s11 = smov 0  }
   0x2 LB: > { %s22_s12 = sadd.s32 1, %s480_s10  ;;  %p427_p0 = scmp.ge.s32.totalorder %s484_s11, 1  ;;  %s484_s11 = sphi %s506_s11, %s13_s11   ;;  %s480_s10 = sphi %s504_s10, %s837_s10   ;;  %s476_s9 = sphi %s502_s9, %s836_s9  }
   0x3   : > { %p23_p1 = scmp.ge.s32.totalorder %s22_s12, 2  ;;  %p134_p2 = scmp.lt.s32.totalorder %s484_s11, 3 }
   0x5   : > { %s839_s12 = smov (%p23_p1, %s22_s12), 0  ;;  %p135_p3 = pnand %p427_p0, %p134_p2 }
   0x6   : > { %p166_p4 = scmp.lt.s32.totalorder (!%p135_p3), %s476_s9, 1  ;;  %p429_p5 = scmp.ne.s32.totalorder (!%p135_p3), %s476_s9, 0 }
   0x7   : > { %138 = sbr.rel (%p135_p3) target bundleno = 53 (0x35), region = 24 }
   0xc   : > { %s167_s13 = scalar_select %p166_p4, %s476_s9, 1 }
   0xd   : > { %190 = sbr.rel (%p429_p5) target bundleno = 32 (0x20), region = 28 }
   0xe   : > { %s436_s14 = smul.u32 104, %s167_s13 }
  0x10   : > { %s523_s17 = scalar_lea.vmem %s833_s0, %s436_s14 }
  0x12   : > { %vm191_vm0 = vcmask 64512   ;;  %vm204_vm1 = vcmask 60416   ;;  %v486_v0 = vmov 0.0  }
  0x13   : > { %192 = vst.msk [vmem:[%s834_s1] sm:$0xff] %vm191_vm0, %v486_v0  ;;  %193 = vst.msk [vmem:[%s834_s1 + $0x8] sm:$0xff] %vm191_vm0, %v486_v0 }
  0x14   : > { %194 = vst.msk [vmem:[%s834_s1 + $0x10] sm:$0xff] %vm191_vm0, %v486_v0  ;;  %195 = vst.msk [vmem:[%s834_s1 + $0x18] sm:$0xff] %vm191_vm0, %v486_v0 }
  0x15   : > { %196 = vst.msk [vmem:[%s834_s1 + $0x20] sm:$0xff] %vm191_vm0, %v486_v0  ;;  %197 = vst.msk [vmem:[%s834_s1 + $0x28] sm:$0xff] %vm191_vm0, %v486_v0 }
  0x16   : > { %198 = vst.msk [vmem:[%s834_s1 + $0x30] sm:$0xff] %vm191_vm0, %v486_v0  ;;  %199 = vst.msk [vmem:[%s834_s1 + $0x38] sm:$0xff] %vm191_vm0, %v486_v0 }
  0x17   : > { %200 = vst.msk [vmem:[%s834_s1 + $0x40] sm:$0xff] %vm191_vm0, %v486_v0  ;;  %201 = vst.msk [vmem:[%s834_s1 + $0x48] sm:$0xff] %vm191_vm0, %v486_v0 }
  0x18   : > { %202 = vst.msk [vmem:[%s834_s1 + $0x50] sm:$0xff] %vm191_vm0, %v486_v0  ;;  %203 = vst.msk [vmem:[%s834_s1 + $0x58] sm:$0xff] %vm191_vm0, %v486_v0 }
  0x19   : > { %206 = vst.msk [vmem:[%s835_s2] sm:$0xff] %vm191_vm0, %v486_v0  ;;  %207 = vst.msk [vmem:[%s835_s2 + $0x8] sm:$0xff] %vm191_vm0, %v486_v0 }
  0x1a   : > { %208 = vst.msk [vmem:[%s835_s2 + $0x10] sm:$0xff] %vm191_vm0, %v486_v0  ;;  %209 = vst.msk [vmem:[%s835_s2 + $0x18] sm:$0xff] %vm191_vm0, %v486_v0 }
  0x1b   : > { %210 = vst.msk [vmem:[%s835_s2 + $0x20] sm:$0xff] %vm191_vm0, %v486_v0  ;;  %211 = vst.msk [vmem:[%s835_s2 + $0x28] sm:$0xff] %vm191_vm0, %v486_v0 }
  0x1c   : > { %212 = vst.msk [vmem:[%s835_s2 + $0x30] sm:$0xff] %vm191_vm0, %v486_v0  ;;  %213 = vst.msk [vmem:[%s835_s2 + $0x38] sm:$0xff] %vm191_vm0, %v486_v0 }
  0x1d   : > { %214 = vst.msk [vmem:[%s835_s2 + $0x40] sm:$0xff] %vm191_vm0, %v486_v0  ;;  %215 = vst.msk [vmem:[%s835_s2 + $0x48] sm:$0xff] %vm191_vm0, %v486_v0 }
  0x1e   : > { %216 = vst.msk [vmem:[%s835_s2 + $0x50] sm:$0xff] %vm191_vm0, %v486_v0  ;;  %217 = vst.msk [vmem:[%s835_s2 + $0x58] sm:$0xff] %vm191_vm0, %v486_v0 }
  0x1f   : > { %205 = vst.msk [vmem:[%s834_s1 + $0x60] sm:$0xf] %vm204_vm1, %v486_v0  ;;  %218 = vst.msk [vmem:[%s835_s2 + $0x60] sm:$0xf] %vm204_vm1, %v486_v0 }
  0x20 PF: > { %v219_v1 = vld [vmem:[%s523_s17] sm:$0xff]  ;;  %vm258_vm2 = vcmask 64512   ;;  %v220_v3 = vld [vmem:[%s523_s17 + $0x8] sm:$0xff]  ;;  %v221_v6 = vld [vmem:[%s523_s17 + $0x10] sm:$0xff]  ;;  %vm271_vm3 = vcmask 60416  }
  0x21   : > { %v232_v2 = vld [vmem:[%s834_s1] sm:$0xff]  ;;  %v233_v5 = vld [vmem:[%s834_s1 + $0x8] sm:$0xff]  ;;  %v234_v7 = vld [vmem:[%s834_s1 + $0x10] sm:$0xff]  ;;  %v286_v22 = vmul.f32 %v219_v1, %v219_v1  ;;  %v287_v27 = vmul.f32 %v220_v3, %v220_v3  ;;  %v288_v28 = vmul.f32 %v221_v6, %v221_v6 }
  0x22   : > { %v245_v4 = vadd.f32 %v232_v2, %v219_v1  ;;  %v246_v8 = vadd.f32 %v233_v5, %v220_v3  ;;  %v247_v9 = vadd.f32 %v234_v7, %v221_v6  ;;  %v222_v10 = vld [vmem:[%s523_s17 + $0x18] sm:$0xff]  ;;  %v223_v12 = vld [vmem:[%s523_s17 + $0x20] sm:$0xff]  ;;  %v224_v15 = vld [vmem:[%s523_s17 + $0x28] sm:$0xff] }
  0x23   : > { %v235_v11 = vld [vmem:[%s834_s1 + $0x18] sm:$0xff]  ;;  %v236_v14 = vld [vmem:[%s834_s1 + $0x20] sm:$0xff]  ;;  %v237_v16 = vld [vmem:[%s834_s1 + $0x28] sm:$0xff]  ;;  %v289_v29 = vmul.f32 %v222_v10, %v222_v10  ;;  %v290_v35 = vmul.f32 %v223_v12, %v223_v12  ;;  %v291_v36 = vmul.f32 %v224_v15, %v224_v15 }
  0x24   : > { %259 = vst.msk [vmem:[%s834_s1] sm:$0xff] %vm258_vm2, %v245_v4  ;;  %v248_v13 = vadd.f32 %v235_v11, %v222_v10  ;;  %260 = vst.msk [vmem:[%s834_s1 + $0x8] sm:$0xff] %vm258_vm2, %v246_v8  ;;  %v249_v17 = vadd.f32 %v236_v14, %v223_v12  ;;  %v250_v18 = vadd.f32 %v237_v16, %v224_v15  ;;  %v225_v19 = vld [vmem:[%s523_s17 + $0x30] sm:$0xff]  ;;  %v226_v21 = vld [vmem:[%s523_s17 + $0x38] sm:$0xff] }
  0x25   : > { %261 = vst.msk [vmem:[%s834_s1 + $0x10] sm:$0xff] %vm258_vm2, %v247_v9  ;;  %v238_v20 = vld [vmem:[%s834_s1 + $0x30] sm:$0xff]  ;;  %v239_v24 = vld [vmem:[%s834_s1 + $0x38] sm:$0xff]  ;;  %v227_v25 = vld [vmem:[%s523_s17 + $0x40] sm:$0xff]  ;;  %v292_v41 = vmul.f32 %v225_v19, %v225_v19  ;;  %v293_v42 = vmul.f32 %v226_v21, %v226_v21 }
  0x26   : > { %262 = vst.msk [vmem:[%s834_s1 + $0x18] sm:$0xff] %vm258_vm2, %v248_v13  ;;  %v251_v23 = vadd.f32 %v238_v20, %v225_v19  ;;  %v240_v26 = vld [vmem:[%s834_s1 + $0x40] sm:$0xff]  ;;  %263 = vst.msk [vmem:[%s834_s1 + $0x20] sm:$0xff] %vm258_vm2, %v249_v17  ;;  %v252_v30 = vadd.f32 %v239_v24, %v226_v21  ;;  %v228_v32 = vld [vmem:[%s523_s17 + $0x48] sm:$0xff]  ;;  %v294_v43 = vmul.f32 %v227_v25, %v227_v25 }
  0x27   : > { %264 = vst.msk [vmem:[%s834_s1 + $0x28] sm:$0xff] %vm258_vm2, %v250_v18  ;;  %v253_v31 = vadd.f32 %v240_v26, %v227_v25  ;;  %v241_v33 = vld [vmem:[%s834_s1 + $0x48] sm:$0xff]  ;;  %v229_v34 = vld [vmem:[%s523_s17 + $0x50] sm:$0xff]  ;;  %v230_v39 = vld [vmem:[%s523_s17 + $0x58] sm:$0xff]  ;;  %v295_v49 = vmul.f32 %v228_v32, %v228_v32 }
  0x28   : > { %265 = vst.msk [vmem:[%s834_s1 + $0x30] sm:$0xff] %vm258_vm2, %v251_v23  ;;  %v254_v37 = vadd.f32 %v241_v33, %v228_v32  ;;  %v242_v38 = vld [vmem:[%s834_s1 + $0x50] sm:$0xff]  ;;  %v243_v40 = vld [vmem:[%s834_s1 + $0x58] sm:$0xff]  ;;  %266 = vst.msk [vmem:[%s834_s1 + $0x38] sm:$0xff] %vm258_vm2, %v252_v30  ;;  %v296_v50 = vmul.f32 %v229_v34, %v229_v34  ;;  %v297_v56 = vmul.f32 %v230_v39, %v230_v39 }
  0x29   : > { %267 = vst.msk [vmem:[%s834_s1 + $0x40] sm:$0xff] %vm258_vm2, %v253_v31  ;;  %v255_v44 = vadd.f32 %v242_v38, %v229_v34  ;;  %v256_v45 = vadd.f32 %v243_v40, %v230_v39  ;;  %v231_v46 = vld [vmem:[%s523_s17 + $0x60] sm:$0xf]  ;;  %v274_v53 = vld [vmem:[%s835_s2 + $0x8] sm:$0xff]  ;;  %v275_v54 = vld [vmem:[%s835_s2 + $0x10] sm:$0xff] }
  0x2a   : > { %v244_v47 = vld [vmem:[%s834_s1 + $0x60] sm:$0xf]  ;;  %268 = vst.msk [vmem:[%s834_s1 + $0x48] sm:$0xff] %vm258_vm2, %v254_v37  ;;  %v276_v55 = vld [vmem:[%s835_s2 + $0x18] sm:$0xff]  ;;  %v298_v57 = vmul.f32 %v231_v46, %v231_v46  ;;  %v300_v58 = vadd.f32 %v287_v27, %v274_v53  ;;  %v301_v59 = vadd.f32 %v288_v28, %v275_v54  ;;  %v278_v62 = vld [vmem:[%s835_s2 + $0x28] sm:$0xff] }
  0x2b   : > { %v273_v48 = vld [vmem:[%s835_s2] sm:$0xff]  ;;  %v257_v51 = vadd.f32 %v244_v47, %v231_v46  ;;  %269 = vst.msk [vmem:[%s834_s1 + $0x50] sm:$0xff] %vm258_vm2, %v255_v44  ;;  %270 = vst.msk [vmem:[%s834_s1 + $0x58] sm:$0xff] %vm258_vm2, %v256_v45  ;;  %v302_v60 = vadd.f32 %v289_v29, %v276_v55  ;;  %v279_v63 = vld [vmem:[%s835_s2 + $0x30] sm:$0xff]  ;;  %v304_v1 = vadd.f32 %v291_v36, %v278_v62 }
  0x2c   : > { %v299_v52 = vadd.f32 %v286_v22, %v273_v48  ;;  %v277_v61 = vld [vmem:[%s835_s2 + $0x20] sm:$0xff]  ;;  %v305_v2 = vadd.f32 %v292_v41, %v279_v63  ;;  %v280_v3 = vld [vmem:[%s835_s2 + $0x38] sm:$0xff]  ;;  %v282_v5 = vld [vmem:[%s835_s2 + $0x48] sm:$0xff]  ;;  %313 = vst.msk [vmem:[%s835_s2 + $0x8] sm:$0xff] %vm258_vm2, %v300_v58 }
  0x2d   : > { %272 = vst.msk [vmem:[%s834_s1 + $0x60] sm:$0xf] %vm271_vm3, %v257_v51  ;;  %v303_v0 = vadd.f32 %v290_v35, %v277_v61  ;;  %v281_v4 = vld [vmem:[%s835_s2 + $0x40] sm:$0xff]  ;;  %v306_v6 = vadd.f32 %v293_v42, %v280_v3  ;;  %v308_v8 = vadd.f32 %v295_v49, %v282_v5  ;;  %v283_v9 = vld [vmem:[%s835_s2 + $0x50] sm:$0xff]  ;;  %v284_v10 = vld [vmem:[%s835_s2 + $0x58] sm:$0xff] }
  0x2e   : > { %312 = vst.msk [vmem:[%s835_s2] sm:$0xff] %vm258_vm2, %v299_v52  ;;  %314 = vst.msk [vmem:[%s835_s2 + $0x10] sm:$0xff] %vm258_vm2, %v301_v59  ;;  %v307_v7 = vadd.f32 %v294_v43, %v281_v4  ;;  %v285_v11 = vld [vmem:[%s835_s2 + $0x60] sm:$0xf]  ;;  %v309_v12 = vadd.f32 %v296_v50, %v283_v9  ;;  %v310_v13 = vadd.f32 %v297_v56, %v284_v10 }
  0x2f   : > { %315 = vst.msk [vmem:[%s835_s2 + $0x18] sm:$0xff] %vm258_vm2, %v302_v60  ;;  %316 = vst.msk [vmem:[%s835_s2 + $0x20] sm:$0xff] %vm258_vm2, %v303_v0  ;;  %v311_v14 = vadd.f32 %v298_v57, %v285_v11 }
  0x30   : > { %317 = vst.msk [vmem:[%s835_s2 + $0x28] sm:$0xff] %vm258_vm2, %v304_v1  ;;  %318 = vst.msk [vmem:[%s835_s2 + $0x30] sm:$0xff] %vm258_vm2, %v305_v2 }
  0x31   : > { %319 = vst.msk [vmem:[%s835_s2 + $0x38] sm:$0xff] %vm258_vm2, %v306_v6  ;;  %320 = vst.msk [vmem:[%s835_s2 + $0x40] sm:$0xff] %vm258_vm2, %v307_v7 }
  0x32   : > { %321 = vst.msk [vmem:[%s835_s2 + $0x48] sm:$0xff] %vm258_vm2, %v308_v8  ;;  %322 = vst.msk [vmem:[%s835_s2 + $0x50] sm:$0xff] %vm258_vm2, %v309_v12 }
  0x33   : > { %323 = vst.msk [vmem:[%s835_s2 + $0x58] sm:$0xff] %vm258_vm2, %v310_v13 }
  0x34   : > { %324 = vst.msk [vmem:[%s835_s2 + $0x60] sm:$0xf] %vm271_vm3, %v311_v14 }
  0x35 PF: > { %s13_s11 = sadd.s32 1, %s484_s11   ;;  %s836_s9 = smov %s480_s10 }
  0x36   : > { %p10_p6 = scmp.ge.s32.totalorder %s13_s11, 4   ;;  %s837_s10 = smov %s839_s12 }
  0x38   :  { %12 = sbr.rel (!%p10_p6) target bundleno = 2 (0x2), region = 70 }

// kernel: norm_data_forward.3
= control target key start
LH: loop header
LB: loop body
LE: loop exit
PB: predicated region body
PF: predicated region fallthrough
CT: control target
= control target key end

     0   :  { %s1065_s18 = smov 0   ;;  %s1067_s19 = smov 0   ;;  %s1427_s0 = inlined_call_operand.vmem [shape: f32[2,100,8], index: 0, kind: input, shape index: {}]   ;;  %s1428_s1 = inlined_call_operand.vmem [shape: f32[100,8], index: 1, kind: input, shape index: {}]   ;;  %s1429_s2 = inlined_call_operand.vmem [shape: f32[100,8], index: 2, kind: input, shape index: {}]   ;;  %s1430_s3 = inlined_call_operand.vmem [shape: f32[100,1], index: 3, kind: input, shape index: {}]   ;;  %s1431_s4 = inlined_call_operand.vmem [shape: f32[100,1], index: 4, kind: input, shape index: {}]   ;;  %s1432_s5 = inlined_call_operand.vmem [shape: f32[2,100,8], index: 5, kind: output, shape index: {}]  }
   0x1   :  { %s1069_s20 = smov 0  }
   0x2 LB: > { %s24_s21 = sadd.s32 1, %s1028_s19  ;;  %p951_p0 = scmp.ge.s32.totalorder %s1032_s20, 1  ;;  %s1032_s20 = sphi %s1069_s20, %s15_s20   ;;  %s1028_s19 = sphi %s1067_s19, %s1434_s19   ;;  %s1024_s18 = sphi %s1065_s18, %s1433_s18  }
   0x3   : > { %p25_p1 = scmp.ge.s32.totalorder %s24_s21, 2  ;;  %p252_p2 = scmp.lt.s32.totalorder %s1032_s20, 3 }
   0x5   : > { %s1436_s21 = smov (%p25_p1, %s24_s21), 0  ;;  %p253_p3 = pnand %p951_p0, %p252_p2 }
   0x6   : > { %p309_p4 = scmp.lt.s32.totalorder (!%p253_p3), %s1024_s18, 1 }
   0x7   : > { %256 = sbr.rel (%p253_p3) target bundleno = 391 (0x187), region = 40 }
   0xc   : > { %v354_v0 = vld [vmem:[%s1428_s1 + $0x10] sm:$0xff]  ;;  %vm365_vm0 = vcmask 64512   ;;  %v352_v1 = vld [vmem:[%s1428_s1] sm:$0xff]  ;;  %v355_v2 = vld [vmem:[%s1428_s1 + $0x18] sm:$0xff]  ;;  %vm402_vm1 = vcmask 60416   ;;  %v1034_v52 = vmov 0  }
   0xd   : > { %v372_v3 = vsel %vm365_vm0, %v354_v0, 0.0  ;;  %v366_v4 = vsel %vm365_vm0, %v352_v1, 0.0  ;;  %v353_v5 = vld [vmem:[%s1428_s1 + $0x8] sm:$0xff]  ;;  %v375_v6 = vsel %vm365_vm0, %v355_v2, 0.0  ;;  %v356_v9 = vld [vmem:[%s1428_s1 + $0x20] sm:$0xff]  ;;  %v359_v12 = vld [vmem:[%s1428_s1 + $0x38] sm:$0xff]  ;;  %982 = vset.pattern.permute.xlu0 %v1034_v52  ;;  %983 = vset.pattern.permute.xlu1 %v1034_v52 }
   0xe   : > { %373 = vadd.xlane.f32.xlu1 %v372_v3  ;;  %367 = vadd.xlane.f32.xlu0 %v366_v4  ;;  %v369_v7 = vsel %vm365_vm0, %v353_v5, 0.0  ;;  %v357_v8 = vld [vmem:[%s1428_s1 + $0x28] sm:$0xff]  ;;  %v378_v11 = vsel %vm365_vm0, %v356_v9, 0.0  ;;  %v358_v13 = vld [vmem:[%s1428_s1 + $0x30] sm:$0xff]  ;;  %v387_v14 = vsel %vm365_vm0, %v359_v12, 0.0  ;;  %v360_v17 = vld [vmem:[%s1428_s1 + $0x40] sm:$0xff] }
   0xf   : > { %v381_v10 = vsel %vm365_vm0, %v357_v8, 0.0  ;;  %v384_v15 = vsel %vm365_vm0, %v358_v13, 0.0  ;;  %v361_v16 = vld [vmem:[%s1428_s1 + $0x48] sm:$0xff]  ;;  %v390_v19 = vsel %vm365_vm0, %v360_v17, 0.0  ;;  %v363_v20 = vld [vmem:[%s1428_s1 + $0x58] sm:$0xff]  ;;  %v362_v21 = vld [vmem:[%s1428_s1 + $0x50] sm:$0xff] }
  0x10   : > { %v393_v18 = vsel %vm365_vm0, %v361_v16, 0.0  ;;  %v399_v22 = vsel %vm365_vm0, %v363_v20, 0.0  ;;  %v396_v23 = vsel %vm365_vm0, %v362_v21, 0.0  ;;  %v406_v24 = vld [vmem:[%s1429_s2] sm:$0xff]  ;;  %v408_v28 = vld [vmem:[%s1429_s2 + $0x10] sm:$0xff]  ;;  %v407_v29 = vld [vmem:[%s1429_s2 + $0x8] sm:$0xff] }
  0x11   : > { %v364_v25 = vld [vmem:[%s1428_s1 + $0x60] sm:$0xf]  ;;  %v419_v26 = vsel %vm365_vm0, %v406_v24, 0.0  ;;  %v425_v30 = vsel %vm365_vm0, %v408_v28, 0.0  ;;  %v422_v31 = vsel %vm365_vm0, %v407_v29, 0.0  ;;  %v409_v33 = vld [vmem:[%s1429_s2 + $0x18] sm:$0xff] }
  0x12   : > { %376 = vadd.xlane.f32.xlu1 %v375_v6  ;;  %370 = vadd.xlane.f32.xlu0 %v369_v7  ;;  %v403_v27 = vsel %vm402_vm1, %v364_v25, 0.0  ;;  %v410_v32 = vld [vmem:[%s1429_s2 + $0x20] sm:$0xff]  ;;  %v428_v35 = vsel %vm365_vm0, %v409_v33, 0.0  ;;  %v412_v36 = vld [vmem:[%s1429_s2 + $0x30] sm:$0xff]  ;;  %v411_v37 = vld [vmem:[%s1429_s2 + $0x28] sm:$0xff]  ;;  %s1438_s18 = smov (!%p309_p4, %s1024_s18), 1 }
  0x13   : > { %v431_v34 = vsel %vm365_vm0, %v410_v32, 0.0  ;;  %v437_v38 = vsel %vm365_vm0, %v412_v36, 0.0  ;;  %v434_v39 = vsel %vm365_vm0, %v411_v37, 0.0  ;;  %v414_v40 = vld [vmem:[%s1429_s2 + $0x40] sm:$0xff]  ;;  %v413_v41 = vld [vmem:[%s1429_s2 + $0x38] sm:$0xff]  ;;  %v416_v44 = vld [vmem:[%s1429_s2 + $0x50] sm:$0xff] }
  0x14   : > { %v443_v42 = vsel %vm365_vm0, %v414_v40, 0.0  ;;  %v440_v43 = vsel %vm365_vm0, %v413_v41, 0.0  ;;  %v415_v45 = vld [vmem:[%s1429_s2 + $0x48] sm:$0xff]  ;;  %v449_v46 = vsel %vm365_vm0, %v416_v44, 0.0  ;;  %v418_v48 = vld [vmem:[%s1429_s2 + $0x60] sm:$0xf] }
  0x15   : > { %v446_v47 = vsel %vm365_vm0, %v415_v45, 0.0  ;;  %v417_v49 = vld [vmem:[%s1429_s2 + $0x58] sm:$0xff]  ;;  %v455_v50 = vsel %vm402_vm1, %v418_v48, 0.0  ;;  %s956_s17 = smul.u32 104, %s1438_s18 }
  0x16   : > { %382 = vadd.xlane.f32.xlu1 %v381_v10  ;;  %379 = vadd.xlane.f32.xlu0 %v378_v11  ;;  %v452_v51 = vsel %vm365_vm0, %v417_v49, 0.0 }
  0x17   : > { %s1368_s24 = scalar_lea.vmem %s1427_s0, %s956_s17  ;;  %s1377_s26 = scalar_lea.vmem %s1432_s5, %s956_s17 }
  0x1a   : > { %388 = vadd.xlane.f32.xlu1 %v387_v14  ;;  %385 = vadd.xlane.f32.xlu0 %v384_v15 }
  0x1e   : > { %394 = vadd.xlane.f32.xlu1 %v393_v18  ;;  %391 = vadd.xlane.f32.xlu0 %v390_v19 }
  0x22   : > { %400 = vadd.xlane.f32.xlu1 %v399_v22  ;;  %397 = vadd.xlane.f32.xlu0 %v396_v23 }
  0x26   : > { %420 = vadd.xlane.f32.xlu1 %v419_v26  ;;  %404 = vadd.xlane.f32.xlu0 %v403_v27 }
  0x2a   : > { %426 = vadd.xlane.f32.xlu1 %v425_v30  ;;  %423 = vadd.xlane.f32.xlu0 %v422_v31 }
  0x2e   : > { %432 = vadd.xlane.f32.xlu1 %v431_v34  ;;  %429 = vadd.xlane.f32.xlu0 %v428_v35 }
  0x32   : > { %438 = vadd.xlane.f32.xlu1 %v437_v38  ;;  %435 = vadd.xlane.f32.xlu0 %v434_v39 }
  0x36   : > { %444 = vadd.xlane.f32.xlu1 %v443_v42  ;;  %441 = vadd.xlane.f32.xlu0 %v440_v43 }
  0x3a   : > { %450 = vadd.xlane.f32.xlu1 %v449_v46  ;;  %447 = vadd.xlane.f32.xlu0 %v446_v47 }
  0x3e   : > { %456 = vadd.xlane.f32.xlu1 %v455_v50  ;;  %453 = vadd.xlane.f32.xlu0 %v452_v51 }
  0x97   : > { %v374_v53 = vpop.xlane.xlu1 %373  ;;  %v368_v54 = vpop.xlane.xlu0 %367 }
  0x98   : > { %v1193_v1 = vmul.f32 0.0625, %v368_v54  ;;  %v1195_v2 = vmul.f32 0.0625, %v374_v53  ;;  %v549_v54 = vld [vmem:[%s1430_s3] sm:$0xff] }
  0x9a   : > { %v484_v5 = vmul.f32 %v1193_v1, %v1193_v1  ;;  %v486_v9 = vmul.f32 %v1195_v2, %v1195_v2 }
  0x9b   : > { %v377_v55 = vpop.xlane.xlu1 %376  ;;  %v371_v56 = vpop.xlane.xlu0 %370 }
  0x9c   : > { %v1201_v6 = vmul.f32 0.0625, %v371_v56  ;;  %v1207_v16 = vmul.f32 0.0625, %v377_v55 }
  0x9e   : > { %v485_v12 = vmul.f32 %v1201_v6, %v1201_v6  ;;  %v487_v26 = vmul.f32 %v1207_v16, %v1207_v16 }
  0x9f   : > { %v383_v57 = vpop.xlane.xlu1 %382  ;;  %v380_v58 = vpop.xlane.xlu0 %379 }
  0xa0   : > { %v1209_v17 = vmul.f32 0.0625, %v380_v58  ;;  %v1213_v27 = vmul.f32 0.0625, %v383_v57 }
  0xa2   : > { %v488_v28 = vmul.f32 %v1209_v17, %v1209_v17  ;;  %v489_v38 = vmul.f32 %v1213_v27, %v1213_v27 }
  0xa3   : > { %v389_v59 = vpop.xlane.xlu1 %388  ;;  %v386_v60 = vpop.xlane.xlu0 %385 }
  0xa4   : > { %v1217_v36 = vmul.f32 0.0625, %v386_v60  ;;  %v1225_v48 = vmul.f32 0.0625, %v389_v59 }
  0xa6   : > { %v490_v45 = vmul.f32 %v1217_v36, %v1217_v36  ;;  %v491_v59 = vmul.f32 %v1225_v48, %v1225_v48 }
  0xa7   : > { %v395_v61 = vpop.xlane.xlu1 %394  ;;  %v392_v62 = vpop.xlane.xlu0 %391 }
  0xa8   : > { %v1223_v46 = vmul.f32 0.0625, %v395_v61  ;;  %v1232_v56 = vmul.f32 0.0625, %v392_v62 }
  0xaa   : > { %v493_v55 = vmul.f32 %v1223_v46, %v1223_v46  ;;  %v492_v62 = vmul.f32 %v1232_v56, %v1232_v56 }
  0xab   : > { %v1189_v63 = vpop.xlane.xlu1 %400  ;;  %v1191_v0 = vpop.xlane.xlu0 %397 }
  0xac   : > { %v1237_v60 = vmul.f32 0.0625, %v1189_v63  ;;  %v550_v63 = vld [vmem:[%s1430_s3 + $0x8] sm:$0xff] }
  0xaf   : > { %v421_v3 = vpop.xlane.xlu1 %420  ;;  %v1197_v4 = vpop.xlane.xlu0 %404 }
  0xb0   : > { %v471_v7 = vmul.f32 0.0625, %v421_v3 }
  0xb2   : > { %v497_v8 = vsub.f32 %v471_v7, %v484_v5 }
  0xb3   : > { %v427_v10 = vpop.xlane.xlu1 %426  ;;  %v424_v11 = vpop.xlane.xlu0 %423 }
  0xb4   : > { %v510_v13 = vmax.f32 %v497_v8, 0.0  ;;  %v473_v14 = vmul.f32 0.0625, %v427_v10  ;;  %v472_v15 = vmul.f32 0.0625, %v424_v11 }
  0xb6   : > { %v523_v18 = vadd.f32 1e-05, %v510_v13  ;;  %v499_v19 = vsub.f32 %v473_v14, %v486_v9  ;;  %v498_v20 = vsub.f32 %v472_v15, %v485_v12  ;;  %v1244_v12 = vmul.f32 0.0625, %v1191_v0 }
  0xb7   : > { %v433_v21 = vpop.xlane.xlu1 %432  ;;  %v430_v22 = vpop.xlane.xlu0 %429  ;;  %v495_v14 = vmul.f32 %v1237_v60, %v1237_v60 }
  0xb8   : > { %984 = vrsqrt.f32 %v523_v18  ;;  %v512_v23 = vmax.f32 %v499_v19, 0.0  ;;  %v511_v24 = vmax.f32 %v498_v20, 0.0  ;;  %v475_v25 = vmul.f32 0.0625, %v433_v21 }
  0xb9   : > { %v474_v29 = vmul.f32 0.0625, %v430_v22 }
  0xba   : > { %v524_v30 = vadd.f32 1e-05, %v511_v24  ;;  %v525_v31 = vadd.f32 1e-05, %v512_v23  ;;  %v501_v32 = vsub.f32 %v475_v25, %v488_v28 }
  0xbb   : > { %v500_v33 = vsub.f32 %v474_v29, %v487_v26  ;;  %v439_v34 = vpop.xlane.xlu1 %438  ;;  %v436_v35 = vpop.xlane.xlu0 %435  ;;  %v494_v26 = vmul.f32 %v1244_v12, %v1244_v12  ;;  %v551_v29 = vld [vmem:[%s1430_s3 + $0x10] sm:$0xff] }
  0xbc   : > { %v476_v37 = vmul.f32 0.0625, %v436_v35  ;;  %986 = vrsqrt.f32 %v524_v30  ;;  %v477_v40 = vmul.f32 0.0625, %v439_v34  ;;  %v514_v41 = vmax.f32 %v501_v32, 0.0 }
  0xbd   : > { %v513_v39 = vmax.f32 %v500_v33, 0.0  ;;  %988 = vrsqrt.f32 %v525_v31  ;;  %v1260_v30 = vmul.f32 0.0625, %v1197_v4 }
  0xbe   : > { %v502_v43 = vsub.f32 %v476_v37, %v489_v38  ;;  %v503_v49 = vsub.f32 %v477_v40, %v490_v45  ;;  %v527_v50 = vadd.f32 1e-05, %v514_v41  ;;  %v552_v40 = vld [vmem:[%s1430_s3 + $0x18] sm:$0xff] }
  0xbf   : > { %v526_v42 = vadd.f32 1e-05, %v513_v39  ;;  %v442_v44 = vpop.xlane.xlu0 %441  ;;  %v445_v47 = vpop.xlane.xlu1 %444  ;;  %v496_v4 = vmul.f32 %v1260_v30, %v1260_v30 }
  0xc0   : > { %v515_v51 = vmax.f32 %v502_v43, 0.0  ;;  %v478_v52 = vmul.f32 0.0625, %v442_v44  ;;  %v516_v61 = vmax.f32 %v503_v49, 0.0  ;;  %v479_v3 = vmul.f32 0.0625, %v445_v47  ;;  %v553_v47 = vld [vmem:[%s1430_s3 + $0x20] sm:$0xff] }
  0xc1   : > { %990 = vrsqrt.f32 %v526_v42 }
  0xc2   : > { %992 = vrsqrt.f32 %v527_v50  ;;  %v528_v9 = vadd.f32 1e-05, %v515_v51  ;;  %v504_v10 = vsub.f32 %v478_v52, %v491_v59  ;;  %v529_v19 = vadd.f32 1e-05, %v516_v61 }
  0xc3   : > { %v448_v53 = vpop.xlane.xlu0 %447  ;;  %v451_v5 = vpop.xlane.xlu1 %450  ;;  %v505_v20 = vsub.f32 %v479_v3, %v492_v62  ;;  %v555_v3 = vld [vmem:[%s1430_s3 + $0x30] sm:$0xff] }
  0xc4   : > { %v480_v57 = vmul.f32 0.0625, %v448_v53  ;;  %v481_v21 = vmul.f32 0.0625, %v451_v5  ;;  %994 = vrsqrt.f32 %v528_v9  ;;  %v517_v23 = vmax.f32 %v504_v10, 0.0  ;;  %v554_v53 = vld [vmem:[%s1430_s3 + $0x28] sm:$0xff]  ;;  %v560_v5 = vld [vmem:[%s1430_s3 + $0x58] sm:$0xff] }
  0xc5   : > { %v985_v58 = vpop.eup %984  ;;  %v518_v32 = vmax.f32 %v505_v20, 0.0 }
  0xc6   : > { %v506_v7 = vsub.f32 %v480_v57, %v493_v55  ;;  %v1239_v8 = vmul.f32 %v985_v58, %v549_v54  ;;  %v507_v33 = vsub.f32 %v481_v21, %v494_v26  ;;  %v530_v34 = vadd.f32 1e-05, %v517_v23  ;;  %v558_v54 = vld [vmem:[%s1430_s3 + $0x48] sm:$0xff] }
  0xc7   : > { %v454_v11 = vpop.xlane.xlu0 %453  ;;  %v457_v28 = vpop.xlane.xlu1 %456  ;;  %v531_v41 = vadd.f32 1e-05, %v518_v32 }
  0xc8   : > { %v519_v13 = vmax.f32 %v506_v7, 0.0  ;;  %629 = vperm.xlu0 %982, %v1239_v8   ;;  %v482_v15 = vmul.f32 0.0625, %v454_v11  ;;  %v483_v35 = vmul.f32 0.0625, %v457_v28  ;;  %v520_v42 = vmax.f32 %v507_v33, 0.0 }
  0xc9   : > { %v987_v18 = vpop.eup %986  ;;  %v588_v11 = vmul.f32 %v1239_v8, %v1193_v1  ;;  %v557_v1 = vld [vmem:[%s1430_s3 + $0x40] sm:$0xff]  ;;  %v577_v8 = vld [vmem:[%s1431_s4 + $0x10] sm:$0xff] }
  0xca   : > { %v532_v22 = vadd.f32 1e-05, %v519_v13  ;;  %v508_v0 = vsub.f32 %v482_v15, %v495_v14  ;;  %v1252_v24 = vmul.f32 %v987_v18, %v550_v63  ;;  %v989_v25 = vpop.eup %988  ;;  %v509_v43 = vsub.f32 %v483_v35, %v496_v4  ;;  %v556_v13 = vld [vmem:[%s1430_s3 + $0x38] sm:$0xff]  ;;  %v575_v63 = vld [vmem:[%s1431_s4] sm:$0xff] }
  0xcb   : > { %v564_v38 = vmul.f32 %v989_v25, %v551_v29  ;;  %v533_v49 = vadd.f32 1e-05, %v520_v42  ;;  %v601_v15 = vsub.f32 %v575_v63, %v588_v11  ;;  %v618_v63 = vld [vmem:[%s1368_s24 + $0x20] sm:$0xff] }
  0xcc   : > { %996 = vrsqrt.f32 %v532_v22  ;;  %v521_v31 = vmax.f32 %v508_v0, 0.0  ;;  %634 = vperm.xlu1 %983, %v1252_v24   ;;  %v522_v50 = vmax.f32 %v509_v43, 0.0  ;;  %v579_v0 = vld [vmem:[%s1431_s4 + $0x20] sm:$0xff] }
  0xcd   : > { %998 = vrsqrt.f32 %v529_v19  ;;  %v590_v18 = vmul.f32 %v564_v38, %v1195_v2  ;;  %v559_v2 = vld [vmem:[%s1430_s3 + $0x50] sm:$0xff] }
  0xce   : > { %v534_v37 = vadd.f32 1e-05, %v521_v31  ;;  %v991_v39 = vpop.eup %990  ;;  %v535_v58 = vadd.f32 1e-05, %v522_v50  ;;  %v581_v31 = vld [vmem:[%s1431_s4 + $0x30] sm:$0xff]  ;;  %v584_v50 = vld [vmem:[%s1431_s4 + $0x48] sm:$0xff] }
  0xcf   : > { %v1268_v44 = vmul.f32 %v991_v39, %v552_v40  ;;  %v993_v45 = vpop.eup %992  ;;  %v603_v21 = vsub.f32 %v577_v8, %v590_v18 }
  0xd0   : > { %1000 = vrsqrt.f32 %v534_v37  ;;  %639 = vperm.xlu1 %983, %v564_v38   ;;  %v566_v51 = vmul.f32 %v993_v45, %v553_v47  ;;  %v583_v37 = vld [vmem:[%s1431_s4 + $0x40] sm:$0xff] }
  0xd1   : > { %1002 = vrsqrt.f32 %v530_v34  ;;  %v995_v52 = vpop.eup %994  ;;  %v589_v34 = vmul.f32 %v1252_v24, %v1201_v6  ;;  %v591_v40 = vmul.f32 %v1268_v44, %v1207_v16  ;;  %v578_v6 = vld [vmem:[%s1431_s4 + $0x18] sm:$0xff]  ;;  %v580_v16 = vld [vmem:[%s1431_s4 + $0x28] sm:$0xff] }
  0xd2   : > { %1004 = vrsqrt.f32 %v531_v41  ;;  %v567_v59 = vmul.f32 %v995_v52, %v554_v53  ;;  %v592_v22 = vmul.f32 %v566_v51, %v1209_v17  ;;  %v561_v17 = vld [vmem:[%s1430_s3 + $0x60] sm:$0xf]  ;;  %v586_v52 = vld [vmem:[%s1431_s4 + $0x58] sm:$0xff] }
  0xd3   : > { %1006 = vrsqrt.f32 %v533_v49  ;;  %v604_v24 = vsub.f32 %v578_v6, %v591_v40 }
  0xd4   : > { %644 = vperm.xlu1 %983, %v1268_v44   ;;  %1008 = vrsqrt.f32 %v535_v58  ;;  %v605_v26 = vsub.f32 %v579_v0, %v592_v22  ;;  %v593_v42 = vmul.f32 %v567_v59, %v1213_v27  ;;  %v582_v27 = vld [vmem:[%s1431_s4 + $0x38] sm:$0xff] }
  0xd6   : > { %v606_v44 = vsub.f32 %v580_v16, %v593_v42  ;;  %v621_v42 = vld [vmem:[%s1368_s24 + $0x38] sm:$0xff] }
  0xd8   : > { %649 = vperm.xlu1 %983, %v566_v51  }
  0xd9   : > { %v997_v55 = vpop.eup %996 }
  0xda   : > { %v999_v57 = vpop.eup %998  ;;  %v1280_v61 = vmul.f32 %v997_v55, %v558_v54 }
  0xdb   : > { %v568_v9 = vmul.f32 %v999_v57, %v555_v3 }
  0xdc   : > { %654 = vperm.xlu1 %983, %v567_v59   ;;  %674 = vperm.xlu0 %982, %v1280_v61   ;;  %v597_v49 = vmul.f32 %v1280_v61, %v1223_v46 }
  0xdd   : > { %v1001_v7 = vpop.eup %1000  ;;  %v594_v28 = vmul.f32 %v568_v9, %v1217_v36  ;;  %v576_v36 = vld [vmem:[%s1431_s4 + $0x8] sm:$0xff] }
  0xde   : > { %v1289_v10 = vmul.f32 %v1001_v7, %v560_v5  ;;  %v1003_v62 = vpop.eup %1002  ;;  %v602_v38 = vsub.f32 %v576_v36, %v589_v34  ;;  %v610_v51 = vsub.f32 %v584_v50, %v597_v49  ;;  %v625_v50 = vld [vmem:[%s1368_s24 + $0x58] sm:$0xff] }
  0xdf   : > { %v569_v14 = vmul.f32 %v1003_v62, %v556_v13  ;;  %v1005_v19 = vpop.eup %1004  ;;  %v607_v33 = vsub.f32 %v581_v31, %v594_v28  ;;  %v624_v31 = vld [vmem:[%s1368_s24 + $0x50] sm:$0xff] }
  0xe0   : > { %659 = vperm.xlu1 %983, %v568_v9   ;;  %684 = vperm.xlu0 %982, %v1289_v10   ;;  %v570_v20 = vmul.f32 %v1005_v19, %v557_v1  ;;  %v1007_v23 = vpop.eup %1006  ;;  %v616_v9 = vld [vmem:[%s1368_s24 + $0x10] sm:$0xff] }
  0xe1   : > { %v572_v25 = vmul.f32 %v1007_v23, %v559_v2  ;;  %v1009_v29 = vpop.eup %1008  ;;  %v595_v47 = vmul.f32 %v569_v14, %v1225_v48  ;;  %v599_v48 = vmul.f32 %v1289_v10, %v1237_v60  ;;  %v614_v60 = vld [vmem:[%s1368_s24] sm:$0xff]  ;;  %v620_v1 = vld [vmem:[%s1368_s24 + $0x30] sm:$0xff]  ;;  %v615_v23 = vld [vmem:[%s1368_s24 + $0x8] sm:$0xff] }
  0xe2   : > { %v574_v32 = vmul.f32 %v1009_v29, %v561_v17  ;;  %v596_v35 = vmul.f32 %v570_v20, %v1232_v56  ;;  %v585_v56 = vld [vmem:[%s1431_s4 + $0x50] sm:$0xff]  ;;  %v622_v2 = vld [vmem:[%s1368_s24 + $0x40] sm:$0xff]  ;;  %v617_v17 = vld [vmem:[%s1368_s24 + $0x18] sm:$0xff] }
  0xe3   : > { %v598_v4 = vmul.f32 %v572_v25, %v1244_v12  ;;  %v587_v12 = vld [vmem:[%s1431_s4 + $0x60] sm:$0xf]  ;;  %v612_v53 = vsub.f32 %v586_v52, %v599_v48 }
  0xe4   : > { %664 = vperm.xlu1 %983, %v569_v14   ;;  %707 = vperm.xlu0 %982, %v601_v15   ;;  %v609_v39 = vsub.f32 %v583_v37, %v596_v35  ;;  %v600_v43 = vmul.f32 %v574_v32, %v1260_v30  ;;  %v608_v30 = vsub.f32 %v582_v27, %v595_v47  ;;  %v623_v47 = vld [vmem:[%s1368_s24 + $0x48] sm:$0xff] }
  0xe5   : > { %v611_v41 = vsub.f32 %v585_v56, %v598_v4 }
  0xe6   : > { %v613_v45 = vsub.f32 %v587_v12, %v600_v43 }
  0xe8   : > { %669 = vperm.xlu1 %983, %v570_v20   ;;  %717 = vperm.xlu0 %982, %v603_v21  }
  0xec   : > { %679 = vperm.xlu1 %983, %v572_v25   ;;  %727 = vperm.xlu0 %982, %v605_v26  }
  0xf0   : > { %689 = vperm.xlu1 %983, %v574_v32   ;;  %737 = vperm.xlu0 %982, %v607_v33  }
  0xf4   : > { %712 = vperm.xlu1 %983, %v602_v38   ;;  %747 = vperm.xlu0 %982, %v609_v39   ;;  %v619_v38 = vld [vmem:[%s1368_s24 + $0x28] sm:$0xff]  ;;  %v626_v39 = vld [vmem:[%s1368_s24 + $0x60] sm:$0xf] }
  0xf8   : > { %722 = vperm.xlu1 %983, %v604_v24   ;;  %757 = vperm.xlu0 %982, %v611_v41  }
  0xfc   : > { %732 = vperm.xlu1 %983, %v606_v44   ;;  %767 = vperm.xlu0 %982, %v613_v45  }
 0x100   : > { %742 = vperm.xlu1 %983, %v608_v30  }
 0x104   : > { %752 = vperm.xlu1 %983, %v610_v51  }
 0x108   : > { %762 = vperm.xlu1 %983, %v612_v53  }
 0x143   : > { %v630_v57 = vpop.permute.xlu0 %629 }
 0x144   : > { %v692_v7 = vmul.f32 %v630_v57, %v614_v60 }
 0x147   : > { %v635_v54 = vpop.permute.xlu1 %634 }
 0x148   : > { %v693_v28 = vmul.f32 %v635_v54, %v615_v23 }
 0x14b   : > { %v640_v55 = vpop.permute.xlu1 %639 }
 0x14c   : > { %v694_v13 = vmul.f32 %v640_v55, %v616_v9 }
 0x14f   : > { %v645_v46 = vpop.permute.xlu1 %644 }
 0x150   : > { %v695_v36 = vmul.f32 %v645_v46, %v617_v17 }
 0x153   : > { %v650_v58 = vpop.permute.xlu1 %649 }
 0x154   : > { %v696_v19 = vmul.f32 %v650_v58, %v618_v63 }
 0x157   : > { %v655_v59 = vpop.permute.xlu1 %654  ;;  %v1363_v61 = vpop.permute.xlu0 %674 }
 0x158   : > { %v697_v24 = vmul.f32 %v655_v59, %v619_v38  ;;  %v701_v49 = vmul.f32 %v1363_v61, %v623_v47 }
 0x15b   : > { %v660_v3 = vpop.permute.xlu1 %659  ;;  %v1371_v5 = vpop.permute.xlu0 %684 }
 0x15c   : > { %v698_v22 = vmul.f32 %v660_v3, %v620_v1  ;;  %v703_v52 = vmul.f32 %v1371_v5, %v625_v50 }
 0x15f   : > { %v665_v10 = vpop.permute.xlu1 %664  ;;  %v708_v11 = vpop.permute.xlu0 %707 }
 0x160   : > { %v770_v62 = vadd.f32 %v708_v11, %v692_v7  ;;  %v699_v45 = vmul.f32 %v665_v10, %v621_v42 }
 0x162   : > { %783 = vst.msk [vmem:[%s1377_s26] sm:$0xff] %vm365_vm0, %v770_v62 }
 0x163   : > { %v670_v14 = vpop.permute.xlu1 %669  ;;  %v718_v15 = vpop.permute.xlu0 %717 }
 0x164   : > { %v772_v18 = vadd.f32 %v718_v15, %v694_v13  ;;  %v700_v29 = vmul.f32 %v670_v14, %v622_v2 }
 0x166   : > { %785 = vst.msk [vmem:[%s1377_s26 + $0x10] sm:$0xff] %vm365_vm0, %v772_v18 }
 0x167   : > { %v680_v8 = vpop.permute.xlu1 %679  ;;  %v728_v20 = vpop.permute.xlu0 %727 }
 0x168   : > { %v774_v21 = vadd.f32 %v728_v20, %v696_v19  ;;  %v702_v37 = vmul.f32 %v680_v8, %v624_v31 }
 0x16a   : > { %787 = vst.msk [vmem:[%s1377_s26 + $0x20] sm:$0xff] %vm365_vm0, %v774_v21 }
 0x16b   : > { %v690_v0 = vpop.permute.xlu1 %689  ;;  %v738_v25 = vpop.permute.xlu0 %737 }
 0x16c   : > { %v776_v26 = vadd.f32 %v738_v25, %v698_v22  ;;  %v704_v41 = vmul.f32 %v690_v0, %v626_v39 }
 0x16e   : > { %789 = vst.msk [vmem:[%s1377_s26 + $0x30] sm:$0xff] %vm365_vm0, %v776_v26 }
 0x16f   : > { %v713_v32 = vpop.permute.xlu1 %712  ;;  %v748_v33 = vpop.permute.xlu0 %747 }
 0x170   : > { %v771_v34 = vadd.f32 %v713_v32, %v693_v28  ;;  %v778_v35 = vadd.f32 %v748_v33, %v700_v29 }
 0x172   : > { %784 = vst.msk [vmem:[%s1377_s26 + $0x8] sm:$0xff] %vm365_vm0, %v771_v34  ;;  %791 = vst.msk [vmem:[%s1377_s26 + $0x40] sm:$0xff] %vm365_vm0, %v778_v35 }
 0x173   : > { %v723_v40 = vpop.permute.xlu1 %722  ;;  %v758_v4 = vpop.permute.xlu0 %757 }
 0x174   : > { %v773_v6 = vadd.f32 %v723_v40, %v695_v36  ;;  %v780_v56 = vadd.f32 %v758_v4, %v702_v37 }
 0x176   : > { %786 = vst.msk [vmem:[%s1377_s26 + $0x18] sm:$0xff] %vm365_vm0, %v773_v6  ;;  %793 = vst.msk [vmem:[%s1377_s26 + $0x50] sm:$0xff] %vm365_vm0, %v780_v56 }
 0x177   : > { %v733_v43 = vpop.permute.xlu1 %732  ;;  %v768_v16 = vpop.permute.xlu0 %767 }
 0x178   : > { %v775_v12 = vadd.f32 %v733_v43, %v697_v24  ;;  %v782_v44 = vadd.f32 %v768_v16, %v704_v41 }
 0x17a   : > { %788 = vst.msk [vmem:[%s1377_s26 + $0x28] sm:$0xff] %vm365_vm0, %v775_v12 }
 0x17b   : > { %795 = vst.msk [vmem:[%s1377_s26 + $0x60] sm:$0xf] %vm402_vm1, %v782_v44  ;;  %v743_v27 = vpop.permute.xlu1 %742 }
 0x17c   : > { %v777_v30 = vadd.f32 %v743_v27, %v699_v45 }
 0x17e   : > { %790 = vst.msk [vmem:[%s1377_s26 + $0x38] sm:$0xff] %vm365_vm0, %v777_v30 }
 0x17f   : > { %v753_v51 = vpop.permute.xlu1 %752 }
 0x180   : > { %v779_v48 = vadd.f32 %v753_v51, %v701_v49 }
 0x182   : > { %792 = vst.msk [vmem:[%s1377_s26 + $0x48] sm:$0xff] %vm365_vm0, %v779_v48 }
 0x183   : > { %v763_v53 = vpop.permute.xlu1 %762 }
 0x184   : > { %v781_v54 = vadd.f32 %v763_v53, %v703_v52 }
 0x186   : > { %794 = vst.msk [vmem:[%s1377_s26 + $0x58] sm:$0xff] %vm365_vm0, %v781_v54 }
 0x187 PF: > { %s15_s20 = sadd.s32 1, %s1032_s20   ;;  %s1433_s18 = smov %s1028_s19 }
 0x188   : > { %p12_p5 = scmp.ge.s32.totalorder %s15_s20, 4   ;;  %s1434_s19 = smov %s1436_s21 }
 0x18a   :  { %14 = sbr.rel (!%p12_p5) target bundleno = 2 (0x2), region = 82 }

</bundles_post_ra>
